<compile_context>
chip_gen: v6e
topology: v6e:2x2x1
jax: 0.10.0
libtpu: 0.0.40
codegen_flags: <defaults>
</compile_context>

<pallas_src>
import functools

import jax
import jax.numpy as jnp
from jax.experimental import pallas as pl
from jax.experimental.pallas import tpu as pltpu

_EPS = 1e-5          # nn.BatchNorm1d default eps
_LANE = 128          # TPU lane width: channel padding target


def _round_up(x, m):
    return (x + m - 1) // m * m


# ------------------------------ in-kernel helpers ------------------------------

def _mxu(col, w_ref):
    """bf16 MXU matmul with f32 accumulation (elementwise math stays f32)."""
    return jnp.dot(col.astype(jnp.bfloat16), w_ref[...],
                   preferred_element_type=jnp.float32)


def _store_stats(s_ref, v):
    """Per-sample partial BatchNorm stats (sum, sum of squares) per channel."""
    s_ref[0, 0:1, :] = jnp.sum(v, axis=0, keepdims=True)
    s_ref[0, 1:2, :] = jnp.sum(v * v, axis=0, keepdims=True)


# --------------------------------- stage 1 -------------------------------------
# conv1 (k=3, pad=1) [+ 1x1 strided projection], emitting pre-BN activations and
# partial batch statistics.  The wrapper supplies x pre-padded along L (and
# phase-split for stride=2) so every tap is a contiguous static slice.

def _stage1_s1_kernel(l_out, x_ref, w1_ref, h1_ref, s1_ref):
    xp = x_ref[0]                                             # (L+2, Cp) f32
    col = jnp.concatenate([xp[0:l_out, :],                    # tap k=0 -> x[m-1]
                           xp[1:1 + l_out, :],                # tap k=1 -> x[m]
                           xp[2:2 + l_out, :]], axis=-1)      # tap k=2 -> x[m+1]
    h1 = _mxu(col, w1_ref)                                    # (Lout, Cp) f32
    h1_ref[0] = h1
    _store_stats(s1_ref, h1)


def _stage1_s2_kernel(l_out, xe_ref, xo_ref, w1_ref, wp_ref,
                      h1_ref, p_ref, s1_ref, sp_ref):
    # xe/xo are the even/odd phases of the zero-haloed input: x_pad[j] = x[j-1].
    xe = xe_ref[0]                                            # (l_out+1, Cp)
    xo = xo_ref[0]                                            # (l_out+1, Cp)
    tap0 = xe[0:l_out, :]                                     # x[2m-1]
    tap1 = xo[0:l_out, :]                                     # x[2m]
    tap2 = xe[1:1 + l_out, :]                                 # x[2m+1]
    col = jnp.concatenate([tap0, tap1, tap2], axis=-1)
    h1 = _mxu(col, w1_ref)
    h1_ref[0] = h1
    _store_stats(s1_ref, h1)
    p = _mxu(tap1, wp_ref)                                    # 1x1 stride-2 projection
    p_ref[0] = p
    _store_stats(sp_ref, p)


# --------------------------------- stage 2 -------------------------------------
# Apply bn1 + relu (f32), then conv2 (k=3, pad=1, stride=1) via roll+mask taps.

def _stage2_kernel(h1_ref, sc1_ref, sh1_ref, w2_ref, o_ref, s2_ref):
    a = jnp.maximum(h1_ref[0] * sc1_ref[0] + sh1_ref[0], 0.0)     # (Lout, Cp) f32
    l_out = a.shape[0]
    ridx = jax.lax.broadcasted_iota(jnp.int32, a.shape, 0)
    a_m1 = jnp.where(ridx == 0, 0.0, pltpu.roll(a, 1, 0))               # a[m-1]
    a_p1 = jnp.where(ridx == l_out - 1, 0.0, pltpu.roll(a, l_out - 1, 0))  # a[m+1]
    col = jnp.concatenate([a_m1, a, a_p1], axis=-1)
    o = _mxu(col, w2_ref)
    o_ref[0] = o
    _store_stats(s2_ref, o)


# --------------------------------- stage 3 -------------------------------------
# Apply bn2, add shortcut (identity or bn(projection)), final relu.

def _stage3_kernel(has_proj, *refs):
    if has_proj:
        o_ref, p_ref, sc2_ref, sh2_ref, scp_ref, shp_ref, out_ref = refs
        ident = p_ref[0] * scp_ref[0] + shp_ref[0]
    else:
        o_ref, x_ref, sc2_ref, sh2_ref, out_ref = refs
        ident = x_ref[0]
    y = o_ref[0] * sc2_ref[0] + sh2_ref[0] + ident
    out_ref[0] = jnp.maximum(y, 0.0)


# ------------------------------- wrapper (glue) --------------------------------

def _bn_affine(partial_stats, gamma, beta, count):
    """Fold batch statistics into per-channel scale/shift (f32)."""
    s = jnp.sum(partial_stats, axis=0)                        # (2, Cp)
    mean = s[0] / count
    # one-pass variance is fine here: BN inputs are O(1) post-conv activations
    var = jnp.maximum(s[1] / count - mean * mean, 0.0)
    scale = gamma * jax.lax.rsqrt(var + _EPS)
    shift = beta - mean * scale
    return scale.reshape(1, 1, -1), shift.reshape(1, 1, -1)


def basic_unit_1d_nlc(x_nlc, params, stride):
    """BasicUnit1D forward on channels-last input (N, L, Cin) -> (N, Lout, Ch)."""
    n, length, cin = x_nlc.shape
    ch = params['w1'].shape[0]
    assert stride in (1, 2), "BasicUnit1D kernel supports stride 1 or 2"
    if stride == 1:
        assert cin == ch, "identity shortcut requires in_channels == hidden_channels"
    l_out = (length - 1) // stride + 1

    cp_in = _round_up(cin, _LANE)
    cp = _round_up(ch, _LANE)
    f32 = jnp.float32

    # -------- host-side layout prep: pad channels to lane width, bf16 weights ----
    x_p = jnp.pad(x_nlc.astype(f32), ((0, 0), (0, 0), (0, cp_in - cin)))

    def conv_w(w, cin_p):      # torch (Cout, Cin, K) -> (K*Cin_p, Cout_p) bf16
        k = w.shape[2]
        w_kcc = jnp.transpose(w.astype(f32), (2, 1, 0))
        w_kcc = jnp.pad(w_kcc, ((0, 0), (0, cin_p - w.shape[1]), (0, cp - w.shape[0])))
        return w_kcc.reshape(k * cin_p, cp).astype(jnp.bfloat16)

    bn_vec = lambda v: jnp.pad(v.astype(f32), (0, cp - v.shape[0]))

    w1 = conv_w(params['w1'], cp_in)
    w2 = conv_w(params['w2'], cp)
    g1, b1 = bn_vec(params['g1']), bn_vec(params['b1'])
    g2, b2 = bn_vec(params['g2']), bn_vec(params['b2'])

    row = lambda l, c: pl.BlockSpec((1, l, c), lambda i: (i, 0, 0))
    full = lambda shape: pl.BlockSpec(shape, lambda i: (0,) * len(shape))
    stats_spec = pl.BlockSpec((1, 2, cp), lambda i: (i, 0, 0))
    act = lambda l, c: jax.ShapeDtypeStruct((n, l, c), f32)
    stats_shape = jax.ShapeDtypeStruct((n, 2, cp), f32)
    cparams = pltpu.CompilerParams(dimension_semantics=("parallel",),
                                   vmem_limit_bytes=32 * 1024 * 1024)

    # ------------------------------ stage 1: conv1 (+proj) ----------------------
    if stride == 1:
        x_lpad = jnp.pad(x_p, ((0, 0), (1, 1), (0, 0)))        # zero halo along L
        h1, s1 = pl.pallas_call(
            functools.partial(_stage1_s1_kernel, l_out),
            grid=(n,),
            in_specs=[row(length + 2, cp_in), full(w1.shape)],
            out_specs=[row(l_out, cp), stats_spec],
            out_shape=[act(l_out, cp), stats_shape],
            compiler_params=cparams,
        )(x_lpad, w1)
    else:
        wp = conv_w(params['wp'], cp_in)
        gp, bp = bn_vec(params['gp']), bn_vec(params['bp'])
        # zero halo + even/odd phase split so stride-2 taps are contiguous slices
        lp = 2 * l_out + 2
        x_lpad = jnp.pad(x_p, ((0, 0), (1, lp - 1 - length), (0, 0)))
        xe, xo = x_lpad[:, 0::2, :], x_lpad[:, 1::2, :]        # (N, l_out+1, Cp)
        h1, proj, s1, sp = pl.pallas_call(
            functools.partial(_stage1_s2_kernel, l_out),
            grid=(n,),
            in_specs=[row(l_out + 1, cp_in), row(l_out + 1, cp_in),
                      full(w1.shape), full(wp.shape)],
            out_specs=[row(l_out, cp), row(l_out, cp), stats_spec, stats_spec],
            out_shape=[act(l_out, cp), act(l_out, cp), stats_shape, stats_shape],
            compiler_params=cparams,
        )(xe, xo, w1, wp)

    count = jnp.float32(n * l_out)
    sc1, sh1 = _bn_affine(s1, g1, b1, count)

    # --------------------------- stage 2: bn1+relu, conv2 ------------------------
    o, s2 = pl.pallas_call(
        _stage2_kernel,
        grid=(n,),
        in_specs=[row(l_out, cp), full((1, 1, cp)), full((1, 1, cp)),
                  full(w2.shape)],
        out_specs=[row(l_out, cp), stats_spec],
        out_shape=[act(l_out, cp), stats_shape],
        compiler_params=cparams,
    )(h1, sc1, sh1, w2)

    sc2, sh2 = _bn_affine(s2, g2, b2, count)

    # ---------------------- stage 3: bn2 + shortcut + final relu -----------------
    if stride == 1:
        out_p = pl.pallas_call(
            functools.partial(_stage3_kernel, False),
            grid=(n,),
            in_specs=[row(l_out, cp), row(l_out, cp),
                      full((1, 1, cp)), full((1, 1, cp))],
            out_specs=row(l_out, cp),
            out_shape=act(l_out, cp),
            compiler_params=cparams,
        )(o, x_p, sc2, sh2)
    else:
        scp, shp = _bn_affine(sp, gp, bp, count)
        out_p = pl.pallas_call(
            functools.partial(_stage3_kernel, True),
            grid=(n,),
            in_specs=[row(l_out, cp), row(l_out, cp),
                      full((1, 1, cp)), full((1, 1, cp)),
                      full((1, 1, cp)), full((1, 1, cp))],
            out_specs=row(l_out, cp),
            out_shape=act(l_out, cp),
            compiler_params=cparams,
        )(o, proj, sc2, sh2, scp, shp)

    return out_p[:, :, :ch]                                   # drop channel padding


@functools.partial(jax.jit, static_argnames=("stride",))
def basic_unit_1d(x_ncl, params, stride):
    """PyTorch-layout adapter: (N, Cin, L) -> (N, Ch, Lout).

    Callers that already hold channels-last data should use basic_unit_1d_nlc
    directly and skip these boundary transposes.
    """
    y = basic_unit_1d_nlc(jnp.transpose(x_ncl, (0, 2, 1)), params, stride)
    return jnp.transpose(y, (0, 2, 1))


# ------------------------ deterministic parameter init -------------------------

def init_params(key, in_channels, hidden_channels, stride):
    k1, k2, k3 = jax.random.split(key, 3)

    def conv_w(k, cout, cin, ksize):
        bound = 1.0 / (cin * ksize) ** 0.5
        return jax.random.uniform(k, (cout, cin, ksize), jnp.float32, -bound, bound)

    p = {
        'w1': conv_w(k1, hidden_channels, in_channels, 3),
        'g1': jnp.ones((hidden_channels,), jnp.float32),
        'b1': jnp.zeros((hidden_channels,), jnp.float32),
        'w2': conv_w(k2, hidden_channels, hidden_channels, 3),
        'g2': jnp.ones((hidden_channels,), jnp.float32),
        'b2': jnp.zeros((hidden_channels,), jnp.float32),
    }
    if stride > 1:
        p.update({'wp': conv_w(k3, hidden_channels, in_channels, 1),
                  'gp': jnp.ones((hidden_channels,), jnp.float32),
                  'bp': jnp.zeros((hidden_channels,), jnp.float32)})
    return p


# ------------------------------ pure-JAX reference ------------------------------

def ref_forward(x, p, stride):
    conv = lambda a, w, s, pad: jax.lax.conv_general_dilated(
        a, w, window_strides=(s,), padding=[(pad, pad)],
        dimension_numbers=('NCH', 'OIH', 'NCH'))

    def bn(h, g, b):
        mean = h.mean(axis=(0, 2), keepdims=True)
        var = ((h - mean) ** 2).mean(axis=(0, 2), keepdims=True)
        return (h - mean) * jax.lax.rsqrt(var + _EPS) * g[None, :, None] + b[None, :, None]

    out = jax.nn.relu(bn(conv(x, p['w1'], stride, 1), p['g1'], p['b1']))
    out = bn(conv(out, p['w2'], 1, 1), p['g2'], p['b2'])
    ident = bn(conv(x, p['wp'], stride, 0), p['gp'], p['bp']) if stride > 1 else x
    return jax.nn.relu(out + ident)


if __name__ == "__main__":
    key = jax.random.PRNGKey(0)
    kx1, kp1, kx2, kp2 = jax.random.split(key, 4)

    # Tolerance reflects bf16 MXU operands (elementwise/BN math stays f32);
    # real indexing/stat bugs would produce O(1) errors, far above this.
    TOL = 3e-2

    # Case 1: stride=1 -> identity shortcut (in_channels == hidden_channels)
    x1 = jax.random.normal(kx1, (2, 8, 16), jnp.float32)      # (N, Cin, L)
    p1 = init_params(kp1, 8, 8, 1)
    y1 = jax.block_until_ready(basic_unit_1d(x1, p1, 1))
    r1 = ref_forward(x1, p1, 1)
    assert y1.shape == (2, 8, 16)
    assert jnp.allclose(y1, r1, atol=TOL, rtol=TOL), "stride=1 mismatch vs reference"

    # Case 2: stride=2 -> 1x1 projection shortcut
    x2 = jax.random.normal(kx2, (2, 4, 16), jnp.float32)      # (N, Cin, L)
    p2 = init_params(kp2, 4, 8, 2)
    y2 = jax.block_until_ready(basic_unit_1d(x2, p2, 2))
    r2 = ref_forward(x2, p2, 2)
    assert y2.shape == (2, 8, 8)
    assert jnp.allclose(y2, r2, atol=TOL, rtol=TOL), "stride=2 mismatch vs reference"

    print("KERNEL_OK")
</pallas_src>

<mosaic_0001>
module attributes {stable_mosaic.version = 11 : i64} {
  func.func @_stage3_kernel(%arg0: i32, %arg1: memref<1x16x128xf32, #tpu.memory_space<vmem>>, %arg2: memref<1x16x128xf32, #tpu.memory_space<vmem>>, %arg3: memref<1x1x128xf32, #tpu.memory_space<vmem>>, %arg4: memref<1x1x128xf32, #tpu.memory_space<vmem>>, %arg5: memref<1x16x128xf32, #tpu.memory_space<vmem>>) attributes {dimension_semantics = [#tpu.dimension_semantics<parallel>], iteration_bounds = array<i64: 2>, scalar_prefetch = 0 : i64, scratch_operands = 0 : i64, tpu.core_type = #tpu.core_type<tc>, window_params = [{transform_indices = @transform_0, window_bounds = array<i64: 1, 16, 128>}, {transform_indices = @transform_1, window_bounds = array<i64: 1, 16, 128>}, {pipeline_mode = #tpu.pipeline_mode<synchronous>, transform_indices = @transform_2, window_bounds = array<i64: 1, 1, 128>}, {pipeline_mode = #tpu.pipeline_mode<synchronous>, transform_indices = @transform_3, window_bounds = array<i64: 1, 1, 128>}, {transform_indices = @transform_4, window_bounds = array<i64: 1, 16, 128>}]} {
    %c0 = arith.constant 0 : index
    %c0_0 = arith.constant 0 : index
    %c0_1 = arith.constant 0 : index
    %0 = vector.load %arg2[%c0, %c0_0, %c0_1] : memref<1x16x128xf32, #tpu.memory_space<vmem>>, vector<1x16x128xf32>
    %1 = vector.shape_cast %0 : vector<1x16x128xf32> to vector<16x128xf32>
    %c0_2 = arith.constant 0 : index
    %c0_3 = arith.constant 0 : index
    %c0_4 = arith.constant 0 : index
    %2 = vector.load %arg1[%c0_2, %c0_3, %c0_4] : memref<1x16x128xf32, #tpu.memory_space<vmem>>, vector<1x16x128xf32>
    %3 = vector.shape_cast %2 : vector<1x16x128xf32> to vector<16x128xf32>
    %c0_5 = arith.constant 0 : index
    %c0_6 = arith.constant 0 : index
    %c0_7 = arith.constant 0 : index
    %4 = vector.load %arg3[%c0_5, %c0_6, %c0_7] : memref<1x1x128xf32, #tpu.memory_space<vmem>>, vector<1x1x128xf32>
    %5 = vector.shape_cast %4 : vector<1x1x128xf32> to vector<1x128xf32>
    %6 = vector.broadcast %5 : vector<1x128xf32> to vector<16x128xf32>
    %7 = arith.mulf %3, %6 : vector<16x128xf32>
    %c0_8 = arith.constant 0 : index
    %c0_9 = arith.constant 0 : index
    %c0_10 = arith.constant 0 : index
    %8 = vector.load %arg4[%c0_8, %c0_9, %c0_10] : memref<1x1x128xf32, #tpu.memory_space<vmem>>, vector<1x1x128xf32>
    %9 = vector.shape_cast %8 : vector<1x1x128xf32> to vector<1x128xf32>
    %10 = vector.broadcast %9 : vector<1x128xf32> to vector<16x128xf32>
    %11 = arith.addf %7, %10 : vector<16x128xf32>
    %12 = arith.addf %11, %1 : vector<16x128xf32>
    %cst = arith.constant 0.000000e+00 : f32
    %13 = vector.broadcast %cst : f32 to vector<16x128xf32>
    %14 = arith.maximumf %12, %13 : vector<16x128xf32>
    %c0_11 = arith.constant 0 : index
    %c0_12 = arith.constant 0 : index
    %c0_13 = arith.constant 0 : index
    %15 = vector.load %arg5[%c0_11, %c0_12, %c0_13] : memref<1x16x128xf32, #tpu.memory_space<vmem>>, vector<1x16x128xf32>
    %16 = vector.shape_cast %15 : vector<1x16x128xf32> to vector<16x128xf32>
    %17 = vector.shape_cast %14 : vector<16x128xf32> to vector<1x16x128xf32>
    tpu.vector_store %arg5[%c0_11, %c0_12, %c0_13], %17 {strides = array<i32>} : memref<1x16x128xf32, #tpu.memory_space<vmem>>, vector<1x16x128xf32>,
    return
  }
  func.func @transform_0(%arg0: i32) -> (i32, i32, i32) {
    %c0_i32 = arith.constant 0 : i32
    %c0_i32_0 = arith.constant 0 : i32
    %c0_i32_1 = arith.constant 0 : i32
    return %arg0, %c0_i32, %c0_i32_0 : i32, i32, i32
  }
  func.func @transform_1(%arg0: i32) -> (i32, i32, i32) {
    %c0_i32 = arith.constant 0 : i32
    %c0_i32_0 = arith.constant 0 : i32
    %c0_i32_1 = arith.constant 0 : i32
    return %arg0, %c0_i32, %c0_i32_0 : i32, i32, i32
  }
  func.func @transform_2(%arg0: i32) -> (i32, i32, i32) {
    %c0_i32 = arith.constant 0 : i32
    %c0_i32_0 = arith.constant 0 : i32
    %c0_i32_1 = arith.constant 0 : i32
    %c0_i32_2 = arith.constant 0 : i32
    return %c0_i32, %c0_i32_0, %c0_i32_1 : i32, i32, i32
  }
  func.func @transform_3(%arg0: i32) -> (i32, i32, i32) {
    %c0_i32 = arith.constant 0 : i32
    %c0_i32_0 = arith.constant 0 : i32
    %c0_i32_1 = arith.constant 0 : i32
    %c0_i32_2 = arith.constant 0 : i32
    return %c0_i32, %c0_i32_0, %c0_i32_1 : i32, i32, i32
  }
  func.func @transform_4(%arg0: i32) -> (i32, i32, i32) {
    %c0_i32 = arith.constant 0 : i32
    %c0_i32_0 = arith.constant 0 : i32
    %c0_i32_1 = arith.constant 0 : i32
    return %arg0, %c0_i32, %c0_i32_0 : i32, i32, i32
  }
}

module attributes {stable_mosaic.version = 11 : i64} {
  func.func @_stage1_s1_kernel(%arg0: i32, %arg1: memref<1x18x128xf32, #tpu.memory_space<vmem>>, %arg2: memref<384x128xbf16, #tpu.memory_space<vmem>>, %arg3: memref<1x16x128xf32, #tpu.memory_space<vmem>>, %arg4: memref<1x2x128xf32, #tpu.memory_space<vmem>>) attributes {dimension_semantics = [#tpu.dimension_semantics<parallel>], iteration_bounds = array<i64: 2>, scalar_prefetch = 0 : i64, scratch_operands = 0 : i64, tpu.core_type = #tpu.core_type<tc>, window_params = [{transform_indices = @transform_0, window_bounds = array<i64: 1, 18, 128>}, {pipeline_mode = #tpu.pipeline_mode<synchronous>, transform_indices = @transform_1, window_bounds = array<i64: 384, 128>}, {transform_indices = @transform_2, window_bounds = array<i64: 1, 16, 128>}, {transform_indices = @transform_3, window_bounds = array<i64: 1, 2, 128>}]} {
    %c0 = arith.constant 0 : index
    %c0_0 = arith.constant 0 : index
    %c0_1 = arith.constant 0 : index
    %0 = vector.load %arg1[%c0, %c0_0, %c0_1] : memref<1x18x128xf32, #tpu.memory_space<vmem>>, vector<1x18x128xf32>
    %1 = vector.shape_cast %0 : vector<1x18x128xf32> to vector<18x128xf32>
    %2 = vector.extract_strided_slice %1 {offsets = [0, 0], sizes = [16, 128], strides = [1, 1]} : vector<18x128xf32> to vector<16x128xf32>
    %3 = vector.extract_strided_slice %1 {offsets = [1, 0], sizes = [16, 128], strides = [1, 1]} : vector<18x128xf32> to vector<16x128xf32>
    %4 = vector.extract_strided_slice %1 {offsets = [2, 0], sizes = [16, 128], strides = [1, 1]} : vector<18x128xf32> to vector<16x128xf32>
    %5 = tpu.concatenate %2, %3, %4 in 1 : vector<16x128xf32>, vector<16x128xf32>, vector<16x128xf32> -> vector<16x384xf32>
    %6 = arith.truncf %5 : vector<16x384xf32> to vector<16x384xbf16>
    %c0_2 = arith.constant 0 : index
    %c0_3 = arith.constant 0 : index
    %7 = vector.load %arg2[%c0_2, %c0_3] : memref<384x128xbf16, #tpu.memory_space<vmem>>, vector<384x128xbf16>
    %cst = arith.constant dense<0.000000e+00> : vector<16x128xf32>
    %8 = tpu.matmul %6, %7, %cst {dimension_numbers = #tpu.dot_dimension_numbers<[1], [0], [0], [1], [0, 0, 1, 1], [], []>} : vector<16x384xbf16>, vector<384x128xbf16>, vector<16x128xf32> -> vector<16x128xf32>
    %c0_4 = arith.constant 0 : index
    %c0_5 = arith.constant 0 : index
    %c0_6 = arith.constant 0 : index
    %9 = vector.load %arg3[%c0_4, %c0_5, %c0_6] : memref<1x16x128xf32, #tpu.memory_space<vmem>>, vector<1x16x128xf32>
    %10 = vector.shape_cast %9 : vector<1x16x128xf32> to vector<16x128xf32>
    %11 = vector.shape_cast %8 : vector<16x128xf32> to vector<1x16x128xf32>
    tpu.vector_store %arg3[%c0_4, %c0_5, %c0_6], %11 {strides = array<i32>} : memref<1x16x128xf32, #tpu.memory_space<vmem>>, vector<1x16x128xf32>,
    %cst_7 = arith.constant dense<0.000000e+00> : vector<128xf32>
    %12 = vector.multi_reduction <add>, %8, %cst_7 [0] : vector<16x128xf32> to vector<128xf32>
    %13 = vector.shape_cast %12 : vector<128xf32> to vector<1x128xf32>
    %c0_8 = arith.constant 0 : index
    %c0_9 = arith.constant 0 : index
    %c0_10 = arith.constant 0 : index
    %14 = vector.load %arg4[%c0_8, %c0_9, %c0_10] : memref<1x2x128xf32, #tpu.memory_space<vmem>>, vector<1x1x128xf32>
    %15 = vector.shape_cast %14 : vector<1x1x128xf32> to vector<1x128xf32>
    %16 = vector.shape_cast %13 : vector<1x128xf32> to vector<1x1x128xf32>
    tpu.vector_store %arg4[%c0_8, %c0_9, %c0_10], %16 {strides = array<i32>} : memref<1x2x128xf32, #tpu.memory_space<vmem>>, vector<1x1x128xf32>,
    %17 = arith.mulf %8, %8 : vector<16x128xf32>
    %cst_11 = arith.constant dense<0.000000e+00> : vector<128xf32>
    %18 = vector.multi_reduction <add>, %17, %cst_11 [0] : vector<16x128xf32> to vector<128xf32>
    %19 = vector.shape_cast %18 : vector<128xf32> to vector<1x128xf32>
    %c0_12 = arith.constant 0 : index
    %c1 = arith.constant 1 : index
    %c0_13 = arith.constant 0 : index
    %20 = vector.load %arg4[%c0_12, %c1, %c0_13] : memref<1x2x128xf32, #tpu.memory_space<vmem>>, vector<1x1x128xf32>
    %21 = vector.shape_cast %20 : vector<1x1x128xf32> to vector<1x128xf32>
    %22 = vector.shape_cast %19 : vector<1x128xf32> to vector<1x1x128xf32>
    tpu.vector_store %arg4[%c0_12, %c1, %c0_13], %22 {strides = array<i32>} : memref<1x2x128xf32, #tpu.memory_space<vmem>>, vector<1x1x128xf32>,
    return
  }
  func.func @transform_0(%arg0: i32) -> (i32, i32, i32) {
    %c0_i32 = arith.constant 0 : i32
    %c0_i32_0 = arith.constant 0 : i32
    %c0_i32_1 = arith.constant 0 : i32
    return %arg0, %c0_i32, %c0_i32_0 : i32, i32, i32
  }
  func.func @transform_1(%arg0: i32) -> (i32, i32) {
    %c0_i32 = arith.constant 0 : i32
    %c0_i32_0 = arith.constant 0 : i32
    %c0_i32_1 = arith.constant 0 : i32
    return %c0_i32, %c0_i32_0 : i32, i32
  }
  func.func @transform_2(%arg0: i32) -> (i32, i32, i32) {
    %c0_i32 = arith.constant 0 : i32
    %c0_i32_0 = arith.constant 0 : i32
    %c0_i32_1 = arith.constant 0 : i32
    return %arg0, %c0_i32, %c0_i32_0 : i32, i32, i32
  }
  func.func @transform_3(%arg0: i32) -> (i32, i32, i32) {
    %c0_i32 = arith.constant 0 : i32
    %c0_i32_0 = arith.constant 0 : i32
    %c0_i32_1 = arith.constant 0 : i32
    return %arg0, %c0_i32, %c0_i32_0 : i32, i32, i32
  }
}

module attributes {stable_mosaic.version = 11 : i64} {
  func.func @_stage2_kernel(%arg0: i32, %arg1: memref<1x16x128xf32, #tpu.memory_space<vmem>>, %arg2: memref<1x1x128xf32, #tpu.memory_space<vmem>>, %arg3: memref<1x1x128xf32, #tpu.memory_space<vmem>>, %arg4: memref<384x128xbf16, #tpu.memory_space<vmem>>, %arg5: memref<1x16x128xf32, #tpu.memory_space<vmem>>, %arg6: memref<1x2x128xf32, #tpu.memory_space<vmem>>) attributes {dimension_semantics = [#tpu.dimension_semantics<parallel>], iteration_bounds = array<i64: 2>, scalar_prefetch = 0 : i64, scratch_operands = 0 : i64, tpu.core_type = #tpu.core_type<tc>, window_params = [{transform_indices = @transform_0, window_bounds = array<i64: 1, 16, 128>}, {pipeline_mode = #tpu.pipeline_mode<synchronous>, transform_indices = @transform_1, window_bounds = array<i64: 1, 1, 128>}, {pipeline_mode = #tpu.pipeline_mode<synchronous>, transform_indices = @transform_2, window_bounds = array<i64: 1, 1, 128>}, {pipeline_mode = #tpu.pipeline_mode<synchronous>, transform_indices = @transform_3, window_bounds = array<i64: 384, 128>}, {transform_indices = @transform_4, window_bounds = array<i64: 1, 16, 128>}, {transform_indices = @transform_5, window_bounds = array<i64: 1, 2, 128>}]} {
    %c0 = arith.constant 0 : index
    %c0_0 = arith.constant 0 : index
    %c0_1 = arith.constant 0 : index
    %0 = vector.load %arg1[%c0, %c0_0, %c0_1] : memref<1x16x128xf32, #tpu.memory_space<vmem>>, vector<1x16x128xf32>
    %1 = vector.shape_cast %0 : vector<1x16x128xf32> to vector<16x128xf32>
    %c0_2 = arith.constant 0 : index
    %c0_3 = arith.constant 0 : index
    %c0_4 = arith.constant 0 : index
    %2 = vector.load %arg2[%c0_2, %c0_3, %c0_4] : memref<1x1x128xf32, #tpu.memory_space<vmem>>, vector<1x1x128xf32>
    %3 = vector.shape_cast %2 : vector<1x1x128xf32> to vector<1x128xf32>
    %4 = vector.broadcast %3 : vector<1x128xf32> to vector<16x128xf32>
    %5 = arith.mulf %1, %4 : vector<16x128xf32>
    %c0_5 = arith.constant 0 : index
    %c0_6 = arith.constant 0 : index
    %c0_7 = arith.constant 0 : index
    %6 = vector.load %arg3[%c0_5, %c0_6, %c0_7] : memref<1x1x128xf32, #tpu.memory_space<vmem>>, vector<1x1x128xf32>
    %7 = vector.shape_cast %6 : vector<1x1x128xf32> to vector<1x128xf32>
    %8 = vector.broadcast %7 : vector<1x128xf32> to vector<16x128xf32>
    %9 = arith.addf %5, %8 : vector<16x128xf32>
    %cst = arith.constant 0.000000e+00 : f32
    %10 = vector.broadcast %cst : f32 to vector<16x128xf32>
    %11 = arith.maximumf %9, %10 : vector<16x128xf32>
    %12 = tpu.iota {dimensions = array<i32: 0>} : vector<16x128xi32>
    %c0_i32 = arith.constant 0 : i32
    %13 = vector.broadcast %c0_i32 : i32 to vector<16x128xi32>
    %14 = arith.cmpi eq, %12, %13 : vector<16x128xi32>
    %c1_i32 = arith.constant 1 : i32
    %15 = tpu.dynamic_rotate %11 by %c1_i32 dim 0 : vector<16x128xf32>, i32 -> vector<16x128xf32>
    %cst_8 = arith.constant 0.000000e+00 : f32
    %16 = vector.broadcast %cst_8 : f32 to vector<16x128xf32>
    %17 = arith.select %14, %16, %15 : vector<16x128xi1>, vector<16x128xf32>
    %c15_i32 = arith.constant 15 : i32
    %18 = vector.broadcast %c15_i32 : i32 to vector<16x128xi32>
    %19 = arith.cmpi eq, %12, %18 : vector<16x128xi32>
    %c15_i32_9 = arith.constant 15 : i32
    %20 = tpu.dynamic_rotate %11 by %c15_i32_9 dim 0 : vector<16x128xf32>, i32 -> vector<16x128xf32>
    %cst_10 = arith.constant 0.000000e+00 : f32
    %21 = vector.broadcast %cst_10 : f32 to vector<16x128xf32>
    %22 = arith.select %19, %21, %20 : vector<16x128xi1>, vector<16x128xf32>
    %23 = tpu.concatenate %17, %11, %22 in 1 : vector<16x128xf32>, vector<16x128xf32>, vector<16x128xf32> -> vector<16x384xf32>
    %24 = arith.truncf %23 : vector<16x384xf32> to vector<16x384xbf16>
    %c0_11 = arith.constant 0 : index
    %c0_12 = arith.constant 0 : index
    %25 = vector.load %arg4[%c0_11, %c0_12] : memref<384x128xbf16, #tpu.memory_space<vmem>>, vector<384x128xbf16>
    %cst_13 = arith.constant dense<0.000000e+00> : vector<16x128xf32>
    %26 = tpu.matmul %24, %25, %cst_13 {dimension_numbers = #tpu.dot_dimension_numbers<[1], [0], [0], [1], [0, 0, 1, 1], [], []>} : vector<16x384xbf16>, vector<384x128xbf16>, vector<16x128xf32> -> vector<16x128xf32>
    %c0_14 = arith.constant 0 : index
    %c0_15 = arith.constant 0 : index
    %c0_16 = arith.constant 0 : index
    %27 = vector.load %arg5[%c0_14, %c0_15, %c0_16] : memref<1x16x128xf32, #tpu.memory_space<vmem>>, vector<1x16x128xf32>
    %28 = vector.shape_cast %27 : vector<1x16x128xf32> to vector<16x128xf32>
    %29 = vector.shape_cast %26 : vector<16x128xf32> to vector<1x16x128xf32>
    tpu.vector_store %arg5[%c0_14, %c0_15, %c0_16], %29 {strides = array<i32>} : memref<1x16x128xf32, #tpu.memory_space<vmem>>, vector<1x16x128xf32>,
    %cst_17 = arith.constant dense<0.000000e+00> : vector<128xf32>
    %30 = vector.multi_reduction <add>, %26, %cst_17 [0] : vector<16x128xf32> to vector<128xf32>
    %31 = vector.shape_cast %30 : vector<128xf32> to vector<1x128xf32>
    %c0_18 = arith.constant 0 : index
    %c0_19 = arith.constant 0 : index
    %c0_20 = arith.constant 0 : index
    %32 = vector.load %arg6[%c0_18, %c0_19, %c0_20] : memref<1x2x128xf32, #tpu.memory_space<vmem>>, vector<1x1x128xf32>
    %33 = vector.shape_cast %32 : vector<1x1x128xf32> to vector<1x128xf32>
    %34 = vector.shape_cast %31 : vector<1x128xf32> to vector<1x1x128xf32>
    tpu.vector_store %arg6[%c0_18, %c0_19, %c0_20], %34 {strides = array<i32>} : memref<1x2x128xf32, #tpu.memory_space<vmem>>, vector<1x1x128xf32>,
    %35 = arith.mulf %26, %26 : vector<16x128xf32>
    %cst_21 = arith.constant dense<0.000000e+00> : vector<128xf32>
    %36 = vector.multi_reduction <add>, %35, %cst_21 [0] : vector<16x128xf32> to vector<128xf32>
    %37 = vector.shape_cast %36 : vector<128xf32> to vector<1x128xf32>
    %c0_22 = arith.constant 0 : index
    %c1 = arith.constant 1 : index
    %c0_23 = arith.constant 0 : index
    %38 = vector.load %arg6[%c0_22, %c1, %c0_23] : memref<1x2x128xf32, #tpu.memory_space<vmem>>, vector<1x1x128xf32>
    %39 = vector.shape_cast %38 : vector<1x1x128xf32> to vector<1x128xf32>
    %40 = vector.shape_cast %37 : vector<1x128xf32> to vector<1x1x128xf32>
    tpu.vector_store %arg6[%c0_22, %c1, %c0_23], %40 {strides = array<i32>} : memref<1x2x128xf32, #tpu.memory_space<vmem>>, vector<1x1x128xf32>,
    return
  }
  func.func @transform_0(%arg0: i32) -> (i32, i32, i32) {
    %c0_i32 = arith.constant 0 : i32
    %c0_i32_0 = arith.constant 0 : i32
    %c0_i32_1 = arith.constant 0 : i32
    return %arg0, %c0_i32, %c0_i32_0 : i32, i32, i32
  }
  func.func @transform_1(%arg0: i32) -> (i32, i32, i32) {
    %c0_i32 = arith.constant 0 : i32
    %c0_i32_0 = arith.constant 0 : i32
    %c0_i32_1 = arith.constant 0 : i32
    %c0_i32_2 = arith.constant 0 : i32
    return %c0_i32, %c0_i32_0, %c0_i32_1 : i32, i32, i32
  }
  func.func @transform_2(%arg0: i32) -> (i32, i32, i32) {
    %c0_i32 = arith.constant 0 : i32
    %c0_i32_0 = arith.constant 0 : i32
    %c0_i32_1 = arith.constant 0 : i32
    %c0_i32_2 = arith.constant 0 : i32
    return %c0_i32, %c0_i32_0, %c0_i32_1 : i32, i32, i32
  }
  func.func @transform_3(%arg0: i32) -> (i32, i32) {
    %c0_i32 = arith.constant 0 : i32
    %c0_i32_0 = arith.constant 0 : i32
    %c0_i32_1 = arith.constant 0 : i32
    return %c0_i32, %c0_i32_0 : i32, i32
  }
  func.func @transform_4(%arg0: i32) -> (i32, i32, i32) {
    %c0_i32 = arith.constant 0 : i32
    %c0_i32_0 = arith.constant 0 : i32
    %c0_i32_1 = arith.constant 0 : i32
    return %arg0, %c0_i32, %c0_i32_0 : i32, i32, i32
  }
  func.func @transform_5(%arg0: i32) -> (i32, i32, i32) {
    %c0_i32 = arith.constant 0 : i32
    %c0_i32_0 = arith.constant 0 : i32
    %c0_i32_1 = arith.constant 0 : i32
    return %arg0, %c0_i32, %c0_i32_0 : i32, i32, i32
  }
}

</mosaic_0001>

<bundles_post_ra>
// kernel: basic_unit_1d.5
= control target key start
LH: loop header
LB: loop body
LE: loop exit
PB: predicated region body
PF: predicated region fallthrough
CT: control target
= control target key end

     0   :  { %s372_s15 = smov 0   ;;  %s398_s0 = inlined_call_operand.vmem [shape: f32[2,16,128], index: 0, kind: input, shape index: {}]   ;;  %s399_s1 = inlined_call_operand.vmem [shape: f32[2,16,128], index: 1, kind: input, shape index: {}]   ;;  %s400_s2 = inlined_call_operand.vmem [shape: f32[1,1,128], index: 2, kind: input, shape index: {}]   ;;  %s401_s3 = inlined_call_operand.vmem [shape: f32[1,1,128], index: 3, kind: input, shape index: {}]   ;;  %s402_s4 = inlined_call_operand.vmem [shape: f32[2,16,128], index: 4, kind: output, shape index: {}]  }
   0x1 LB: > { %s313_s16 = sadd.s32 4294967295, %s345_s15   ;;  %p317_p0 = scmp.ge.s32.totalorder %s345_s15, 1  ;;  %s345_s15 = sphi %s372_s15, %s14_s15  }
   0x2   : > { %p172_p1 = scmp.lt.s32.totalorder %s345_s15, 3 }
   0x4   : > { %p173_p2 = pnand %p317_p0, %p172_p1 }
   0x5   : > { %p203_p3 = scmp.lt.s32.totalorder (!%p173_p2), %s313_s16, 1 }
   0x6   : > { %176 = sbr.rel (%p173_p2) target bundleno = 24 (0x18), region = 36 }
   0xb   : > { %s404_s16 = smov (!%p203_p3, %s313_s16), 1  ;;  %v324_v0 = vld [vmem:[%s400_s2] ss:$0 sm:$0xff] }
   0xc   : > { %s328_s17 = sshll.u32 %s404_s16, 4  ;;  %v325_v3 = vld [vmem:[%s401_s3] ss:$0 sm:$0xff] }
   0xd   : > { %s207_s22 = scalar_lea.vmem %s398_s0, %s328_s17  ;;  %s212_s25 = scalar_lea.vmem %s399_s1, %s328_s17 }
   0xe   : > { %v220_v1 = vld [vmem:[%s207_s22] sm:$0xff]  ;;  %v221_v2 = vld [vmem:[%s207_s22 + $0x8] sm:$0xff]  ;;  %s217_s30 = scalar_lea.vmem %s402_s4, %s328_s17 }
   0xf   : > { %v229_v4 = vmul.f32 %v324_v0, %v220_v1  ;;  %v230_v5 = vmul.f32 %v324_v0, %v221_v2  ;;  %v218_v6 = vld [vmem:[%s212_s25] sm:$0xff]  ;;  %v219_v7 = vld [vmem:[%s212_s25 + $0x8] sm:$0xff] }
  0x11   : > { %v238_v8 = vadd.f32 %v325_v3, %v229_v4  ;;  %v239_v9 = vadd.f32 %v325_v3, %v230_v5 }
  0x13   : > { %v240_v10 = vadd.f32 %v238_v8, %v218_v6  ;;  %v241_v11 = vadd.f32 %v239_v9, %v219_v7 }
  0x15   : > { %v242_v12 = vmax.f32 %v240_v10, 0.0  ;;  %v243_v13 = vmax.f32 %v241_v11, 0.0 }
  0x17   : > { %244 = vst [vmem:[%s217_s30] sm:$0xff] %v242_v12  ;;  %245 = vst [vmem:[%s217_s30 + $0x8] sm:$0xff] %v243_v13 }
  0x18 PF: > { %s14_s15 = sadd.s32 1, %s345_s15  }
  0x19   : > { %p11_p4 = scmp.ge.s32.totalorder %s14_s15, 4  }
  0x1b   :  { %13 = sbr.rel (!%p11_p4) target bundleno = 1 (0x1), region = 69 }

// kernel: basic_unit_1d.3
= control target key start
LH: loop header
LB: loop body
LE: loop exit
PB: predicated region body
PF: predicated region fallthrough
CT: control target
= control target key end

     0   :  { %s740_s12 = smov 0   ;;  %s852_s0 = inlined_call_operand.vmem [shape: f32[2,18,128], index: 0, kind: input, shape index: {}]   ;;  %s853_s1 = inlined_call_operand.vmem [shape: bf16[384,128], index: 1, kind: input, shape index: {}]   ;;  %s854_s2 = inlined_call_operand.vmem [shape: f32[2,16,128], index: 2, kind: output, shape index: {0}]   ;;  %s855_s3 = inlined_call_operand.vmem [shape: f32[2,2,128], index: 3, kind: output, shape index: {1}]  }
   0x1 LB: > { %s588_s13 = sadd.s32 4294967295, %s716_s12   ;;  %p592_p0 = scmp.ge.s32.totalorder %s716_s12, 1  ;;  %s716_s12 = sphi %s740_s12, %s14_s12  }
   0x2   : > { %p140_p1 = scmp.lt.s32.totalorder %s716_s12, 3 }
   0x4   : > { %p141_p2 = pnand %p592_p0, %p140_p1 }
   0x5   : > { %p168_p3 = scmp.lt.s32.totalorder (!%p141_p2), %s588_s13, 1 }
   0x6   : > { %144 = sbr.rel (%p141_p2) target bundleno = 265 (0x109), region = 28 }
   0xb   : > { %v686_v0 = vld [vmem:[%s853_s1 + $0x78] sm:$0xff]   ;;  %v718_v1 = vmov 0.0   ;;  %vm719_vm0 = vmmov 0   ;;  %v689_v4 = vld [vmem:[%s853_s1 + $0x70] sm:$0xff]   ;;  %v692_v7 = vld [vmem:[%s853_s1 + $0x68] sm:$0xff]   ;;  %s857_s13 = smov (!%p168_p3, %s588_s13), 1 }
   0xc   : > { %655 = vmatprep.subr.bf16.mxu1 %v718_v1  ;;  %v687_v2 = vld [vmem:[%s853_s1 + $0xb8] sm:$0xff]   ;;  %624 = vmatprep.subr.bf16.mxu0 %v686_v0  ;;  %v690_v5 = vld [vmem:[%s853_s1 + $0xb0] sm:$0xff]   ;;  %v693_v8 = vld [vmem:[%s853_s1 + $0xa8] sm:$0xff]   ;;  %s675_s21 = smul.u32 24, %s857_s13  ;;  %vm189_vm1 = vcmask 1046528   ;;  %vm197_vm2 = vcmask 1045504  }
   0xd   : > { %v688_v3 = vld [vmem:[%s853_s1 + $0x38] sm:$0xff]   ;;  %671 = vmatprep.mubr.msk.bf16.mxu1 %vm719_vm0, %v718_v1  ;;  %656 = vmatpush3.bf16.msra.mxu1 %v687_v2  ;;  %v691_v6 = vld [vmem:[%s853_s1 + $0x30] sm:$0xff]   ;;  %v694_v9 = vld [vmem:[%s853_s1 + $0x28] sm:$0xff]   ;;  %s623_s16 = sshll.u32 %s857_s13, 4  ;;  %s596_s20 = sshll.u32 %s857_s13, 1 }
   0xe   : > { %625 = vmatpush3.bf16.msra.mxu0 %v688_v3  ;;  %657 = vmatprep.subr.bf16.mxu1 %v718_v1  ;;  %v695_v10 = vld [vmem:[%s853_s1 + $0x60] sm:$0xff]   ;;  %v698_v13 = vld [vmem:[%s853_s1 + $0x58] sm:$0xff]   ;;  %v701_v16 = vld [vmem:[%s853_s1 + $0x50] sm:$0xff]   ;;  %s172_s30 = scalar_lea.vmem %s852_s0, %s675_s21  ;;  %s177_s19 = scalar_lea.vmem %s854_s2, %s623_s16 }
   0xf   : > { %626 = vmatprep.subr.bf16.mxu0 %v689_v4  ;;  %v696_v11 = vld [vmem:[%s853_s1 + $0xa0] sm:$0xff]   ;;  %v699_v14 = vld [vmem:[%s853_s1 + $0x98] sm:$0xff]   ;;  %v702_v17 = vld [vmem:[%s853_s1 + $0x90] sm:$0xff]   ;;  %s181_s23 = scalar_lea.vmem %s855_s3, %s596_s20 }
  0x10   : > { %v697_v12 = vld [vmem:[%s853_s1 + $0x20] sm:$0xff]   ;;  %v700_v15 = vld [vmem:[%s853_s1 + $0x18] sm:$0xff]   ;;  %v703_v18 = vld [vmem:[%s853_s1 + $0x10] sm:$0xff]  }
  0x11   : > { %658 = vmatpush3.bf16.msra.mxu1 %v690_v5  ;;  %v704_v19 = vld [vmem:[%s853_s1 + $0x48] sm:$0xff]   ;;  %v183_v22 = vld [vmem:[%s172_s30] sm:$0xff]  ;;  %v185_v24 = vld [vmem:[%s172_s30 + $0x10] sm:$0x3] }
  0x12   : > { %627 = vmatpush3.bf16.msra.mxu0 %v691_v6  ;;  %659 = vmatprep.subr.bf16.mxu1 %v718_v1  ;;  %v705_v20 = vld [vmem:[%s853_s1 + $0x88] sm:$0xff]   ;;  %v707_v25 = vld [vmem:[%s853_s1 + $0x40] sm:$0xff]   ;;  %v190_v26 = vrot.slane %v183_v22, 1  ;;  %v193_v28 = vrot.slane %v185_v24, 1  ;;  %v201_v29 = vrot.slane %v185_v24, 2  ;;  %v198_v30 = vrot.slane %v183_v22, 2 }
  0x13   : > { %628 = vmatprep.subr.bf16.mxu0 %v692_v7  ;;  %v706_v21 = vld [vmem:[%s853_s1 + $0x8] sm:$0xff]   ;;  %v708_v32 = vld [vmem:[%s853_s1 + $0x80] sm:$0xff]  }
  0x14   : > { %v184_v23 = vld [vmem:[%s172_s30 + $0x8] sm:$0xff]  ;;  %v709_v35 = vld [vmem:[%s853_s1] sm:$0xff]  }
  0x15   : > { %660 = vmatpush3.bf16.msra.mxu1 %v693_v8  ;;  %v191_v27 = vrot.slane %v184_v23, 1  ;;  %v199_v31 = vrot.slane %v184_v23, 2  ;;  %v205_v40 = vpack.c.bf16 %v184_v23, %v183_v22 }
  0x16   : > { %629 = vmatpush3.bf16.msra.mxu0 %v694_v9  ;;  %661 = vmatprep.subr.bf16.mxu1 %v718_v1 }
  0x17   : > { %630 = vmatprep.subr.bf16.mxu0 %v695_v10  ;;  %v192_v33 = vsel %vm189_vm1, %v190_v26, %v191_v27  ;;  %v194_v34 = vsel %vm189_vm1, %v191_v27, %v193_v28  ;;  %v200_v37 = vsel %vm197_vm2, %v198_v30, %v199_v31  ;;  %v202_v38 = vsel %vm197_vm2, %v199_v31, %v201_v29 }
  0x18   : > { %v206_v36 = vpack.c.bf16 %v194_v34, %v192_v33  ;;  %v207_v39 = vpack.c.bf16 %v202_v38, %v200_v37 }
  0x19   : > { %662 = vmatpush3.bf16.msra.mxu1 %v696_v11 }
  0x1a   : > { %631 = vmatpush3.bf16.msra.mxu0 %v697_v12  ;;  %663 = vmatprep.subr.bf16.mxu1 %v718_v1 }
  0x1b   : > { %632 = vmatprep.subr.bf16.mxu0 %v698_v13  ;;  %432 = vmatprep.mubr.bf16.mxu0 %v206_v36 }
  0x1d   : > { %664 = vmatpush3.bf16.msra.mxu1 %v699_v14 }
  0x1e   : > { %633 = vmatpush3.bf16.msra.mxu0 %v700_v15  ;;  %665 = vmatprep.subr.bf16.mxu1 %v718_v1 }
  0x1f   : > { %634 = vmatprep.subr.bf16.mxu0 %v701_v16 }
  0x21   : > { %666 = vmatpush3.bf16.msra.mxu1 %v702_v17 }
  0x22   : > { %635 = vmatpush3.bf16.msra.mxu0 %v703_v18  ;;  %667 = vmatprep.subr.bf16.mxu1 %v718_v1 }
  0x23   : > { %636 = vmatprep.subr.bf16.mxu0 %v704_v19 }
  0x25   : > { %668 = vmatpush3.bf16.msra.mxu1 %v705_v20 }
  0x26   : > { %637 = vmatpush3.bf16.msra.mxu0 %v706_v21  ;;  %669 = vmatprep.subr.bf16.mxu1 %v718_v1 }
  0x27   : > { %638 = vmatprep.subr.bf16.mxu0 %v707_v25 }
  0x29   : > { %670 = vmatpush3.bf16.msra.mxu1 %v708_v32 }
  0x2a   : > { %639 = vmatpush3.bf16.msra.mxu0 %v709_v35 }
  0x2c   : > { %672 = vmatmul.mubr.bf16.vlgmr.msra.gmra.mxu1 %v207_v39 }
  0x2d   : > { %433 = vmatmul.mubr.bf16.vlgmr.msra.gmra.mxu0 %v205_v40 }
  0xec   : > { %v475_v41 = vpop.f32.mrf.mxu1 }
  0xed   : > { %v640_v42 = vpop.f32.mrf.mxu0 }
  0xee   : > { %v673_v43 = vpop.f32.mrf.mxu1 }
  0xef   : > { %v641_v44 = vpop.f32.mrf.mxu0 }
  0xf0   : > { %v642_v45 = vadd.f32 %v641_v44, %v640_v42  ;;  %v478_v46 = vpop.f32.mrf.mxu1 }
  0xf1   : > { %v643_v47 = vpop.f32.mrf.mxu0 }
  0xf2   : > { %v476_v48 = vadd.f32 %v642_v45, %v475_v41  ;;  %v674_v49 = vpop.f32.mrf.mxu1 }
  0xf3   : > { %v644_v50 = vpop.f32.mrf.mxu0 }
  0xf4   : > { %482 = vst [vmem:[%s177_s19] sm:$0xff] %v476_v48  ;;  %v645_v51 = vadd.f32 %v644_v50, %v643_v47  ;;  %v492_v53 = vmul.f32 %v476_v48, %v476_v48 }
  0xf6   : > { %v479_v52 = vadd.f32 %v645_v51, %v478_v46 }
  0xf8   : > { %483 = vst [vmem:[%s177_s19 + $0x8] sm:$0xff] %v479_v52  ;;  %v484_v54 = vadd.f32 %v479_v52, %v476_v48  ;;  %v493_v55 = vmul.f32 %v479_v52, %v479_v52 }
  0xfa   : > { %v485_v56 = vrot.slane %v484_v54, 4  ;;  %v494_v57 = vadd.f32 %v493_v55, %v492_v53 }
  0xfc   : > { %v486_v58 = vadd.f32 %v485_v56, %v484_v54  ;;  %v495_v59 = vrot.slane %v494_v57, 4 }
  0xfe   : > { %v487_v60 = vrot.slane %v486_v58, 2  ;;  %v496_v61 = vadd.f32 %v495_v59, %v494_v57 }
 0x100   : > { %v488_v62 = vadd.f32 %v487_v60, %v486_v58  ;;  %v497_v63 = vrot.slane %v496_v61, 2 }
 0x102   : > { %v489_v0 = vrot.slane %v488_v62, 1  ;;  %v498_v1 = vadd.f32 %v497_v63, %v496_v61 }
 0x104   : > { %v490_v2 = vadd.f32 %v489_v0, %v488_v62  ;;  %v499_v3 = vrot.slane %v498_v1, 1 }
 0x106   : > { %491 = vst [vmem:[%s181_s23] sm:$0x1] %v490_v2  ;;  %v500_v4 = vadd.f32 %v499_v3, %v498_v1 }
 0x108   : > { %501 = vst [vmem:[%s181_s23 + $0x1] sm:$0x1] %v500_v4 }
 0x109 PF: > { %s14_s12 = sadd.s32 1, %s716_s12  }
 0x10a   : > { %p11_p4 = scmp.ge.s32.totalorder %s14_s12, 4  }
 0x10c   :  { %13 = sbr.rel (!%p11_p4) target bundleno = 1 (0x1), region = 70 }

// kernel: basic_unit_1d.4
= control target key start
LH: loop header
LB: loop body
LE: loop exit
PB: predicated region body
PF: predicated region fallthrough
CT: control target
= control target key end

     0   :  { %s840_s18 = smov 0   ;;  %s959_s0 = inlined_call_operand.vmem [shape: f32[2,16,128], index: 0, kind: input, shape index: {}]   ;;  %s960_s1 = inlined_call_operand.vmem [shape: f32[1,1,128], index: 1, kind: input, shape index: {}]   ;;  %s961_s2 = inlined_call_operand.vmem [shape: f32[1,1,128], index: 2, kind: input, shape index: {}]   ;;  %s962_s3 = inlined_call_operand.vmem [shape: bf16[384,128], index: 3, kind: input, shape index: {}]   ;;  %s963_s4 = inlined_call_operand.vmem [shape: f32[2,16,128], index: 4, kind: output, shape index: {0}]   ;;  %s964_s5 = inlined_call_operand.vmem [shape: f32[2,2,128], index: 5, kind: output, shape index: {1}]  }
   0x1 LB: > { %s663_s19 = sadd.s32 4294967295, %s805_s18   ;;  %p667_p0 = scmp.ge.s32.totalorder %s805_s18, 1  ;;  %s805_s18 = sphi %s840_s18, %s16_s18  }
   0x2   : > { %p190_p1 = scmp.lt.s32.totalorder %s805_s18, 3 }
   0x4   : > { %p191_p2 = pnand %p667_p0, %p190_p1 }
   0x5   : > { %p222_p3 = scmp.lt.s32.totalorder (!%p191_p2), %s663_s19, 1 }
   0x6   : > { %194 = sbr.rel (%p191_p2) target bundleno = 265 (0x109), region = 36 }
   0xb   : > { %v775_v0 = vld [vmem:[%s962_s3 + $0x78] sm:$0xff]   ;;  %v807_v1 = vmov 0.0   ;;  %vm808_vm0 = vmmov 0   ;;  %v778_v4 = vld [vmem:[%s962_s3 + $0x70] sm:$0xff]   ;;  %v781_v7 = vld [vmem:[%s962_s3 + $0x68] sm:$0xff]   ;;  %s966_s19 = smov (!%p222_p3, %s663_s19), 1  ;;  %v259_v17 = vlaneseq }
   0xc   : > { %744 = vmatprep.subr.bf16.mxu1 %v807_v1  ;;  %v776_v2 = vld [vmem:[%s962_s3 + $0xb8] sm:$0xff]   ;;  %713 = vmatprep.subr.bf16.mxu0 %v775_v0  ;;  %v779_v5 = vld [vmem:[%s962_s3 + $0xb0] sm:$0xff]   ;;  %v782_v8 = vld [vmem:[%s962_s3 + $0xa8] sm:$0xff]   ;;  %s709_s29 = sshll.u32 %s966_s19, 4  ;;  %vm809_vm5 = vmmov 1  }
   0xd   : > { %v777_v3 = vld [vmem:[%s962_s3 + $0x38] sm:$0xff]   ;;  %760 = vmatprep.mubr.msk.bf16.mxu1 %vm808_vm0, %v807_v1  ;;  %745 = vmatpush3.bf16.msra.mxu1 %v776_v2  ;;  %v780_v6 = vld [vmem:[%s962_s3 + $0x30] sm:$0xff]   ;;  %v783_v9 = vld [vmem:[%s962_s3 + $0x28] sm:$0xff]   ;;  %s226_s13 = scalar_lea.vmem %s959_s0, %s709_s29  ;;  %v260_v21 = vshrl.u32 %v259_v17, 7  ;;  %s231_s8 = scalar_lea.vmem %s963_s4, %s709_s29 }
   0xe   : > { %714 = vmatpush3.bf16.msra.mxu0 %v777_v3  ;;  %746 = vmatprep.subr.bf16.mxu1 %v807_v1  ;;  %v784_v10 = vld [vmem:[%s962_s3 + $0x60] sm:$0xff]   ;;  %v787_v13 = vld [vmem:[%s962_s3 + $0x58] sm:$0xff]   ;;  %v790_v16 = vld [vmem:[%s962_s3 + $0x50] sm:$0xff]   ;;  %s672_s29 = sshll.u32 %s966_s19, 1 }
   0xf   : > { %715 = vmatprep.subr.bf16.mxu0 %v778_v4  ;;  %v785_v11 = vld [vmem:[%s962_s3 + $0xa0] sm:$0xff]   ;;  %v788_v14 = vld [vmem:[%s962_s3 + $0x98] sm:$0xff]   ;;  %v791_v18 = vld [vmem:[%s962_s3 + $0x90] sm:$0xff]   ;;  %v261_v31 = vadd.s32 8, %v260_v21  ;;  %vm275_vm2 = vcmp.lt.s32.totalorder %v260_v21, 7  ;;  %vm266_vm3 = vcmp.lt.s32.totalorder %v260_v21, 1  ;;  %s235_s11 = scalar_lea.vmem %s964_s5, %s672_s29 }
  0x10   : > { %v786_v12 = vld [vmem:[%s962_s3 + $0x20] sm:$0xff]   ;;  %v789_v15 = vld [vmem:[%s962_s3 + $0x18] sm:$0xff]   ;;  %v792_v19 = vld [vmem:[%s962_s3 + $0x10] sm:$0xff]   ;;  %vm711_vm4 = vcmp.ne.s32.totalorder %v260_v21, 0 }
  0x11   : > { %747 = vmatpush3.bf16.msra.mxu1 %v779_v5  ;;  %v793_v20 = vld [vmem:[%s962_s3 + $0x48] sm:$0xff]   ;;  %v237_v24 = vld [vmem:[%s226_s13] sm:$0xff]  ;;  %vm712_vm1 = vcmp.ne.s32.totalorder %v261_v31, 15  ;;  %vm700_vm7 = vmpackc.low %vm809_vm5, %vm711_vm4 }
  0x12   : > { %716 = vmatpush3.bf16.msra.mxu0 %v780_v6  ;;  %748 = vmatprep.subr.bf16.mxu1 %v807_v1  ;;  %v794_v22 = vld [vmem:[%s962_s3 + $0x88] sm:$0xff]   ;;  %v673_v26 = vld [vmem:[%s960_s1] ss:$0 sm:$0xff]  ;;  %vm704_vm6 = vmpackc.low %vm712_vm1, %vm809_vm5 }
  0x13   : > { %717 = vmatprep.subr.bf16.mxu0 %v781_v7  ;;  %v795_v23 = vld [vmem:[%s962_s3 + $0x8] sm:$0xff]   ;;  %v796_v27 = vld [vmem:[%s962_s3 + $0x40] sm:$0xff]   ;;  %v246_v28 = vmul.f32 %v673_v26, %v237_v24 }
  0x14   : > { %v238_v25 = vld [vmem:[%s226_s13 + $0x8] sm:$0xff]  ;;  %v674_v30 = vld [vmem:[%s961_s2] ss:$0 sm:$0xff] }
  0x15   : > { %749 = vmatpush3.bf16.msra.mxu1 %v782_v8  ;;  %v247_v29 = vmul.f32 %v673_v26, %v238_v25  ;;  %v797_v32 = vld [vmem:[%s962_s3 + $0x80] sm:$0xff]   ;;  %v255_v33 = vadd.f32 %v674_v30, %v246_v28 }
  0x16   : > { %718 = vmatpush3.bf16.msra.mxu0 %v783_v9  ;;  %750 = vmatprep.subr.bf16.mxu1 %v807_v1  ;;  %v798_v35 = vld [vmem:[%s962_s3] sm:$0xff]  }
  0x17   : > { %719 = vmatprep.subr.bf16.mxu0 %v784_v10  ;;  %v256_v34 = vadd.f32 %v674_v30, %v247_v29  ;;  %v257_v36 = vmax.f32 %v255_v33, 0.0 }
  0x19   : > { %751 = vmatpush3.bf16.msra.mxu1 %v785_v11  ;;  %v258_v37 = vmax.f32 %v256_v34, 0.0  ;;  %v264_v38 = vrot.slane %v257_v36, 7  ;;  %v273_v40 = vrot.slane %v257_v36, 1 }
  0x1a   : > { %720 = vmatpush3.bf16.msra.mxu0 %v786_v12  ;;  %752 = vmatprep.subr.bf16.mxu1 %v807_v1 }
  0x1b   : > { %721 = vmatprep.subr.bf16.mxu0 %v787_v13  ;;  %v265_v39 = vrot.slane %v258_v37, 7  ;;  %v274_v41 = vrot.slane %v258_v37, 1  ;;  %v281_v42 = vpack.c.bf16 %v258_v37, %v257_v36 }
  0x1d   : > { %753 = vmatpush3.bf16.msra.mxu1 %v788_v14  ;;  %v276_v43 = vsel %vm275_vm2, %v273_v40, %v274_v41  ;;  %v277_v44 = vsel %vm275_vm2, %v274_v41, %v273_v40  ;;  %v267_v45 = vsel %vm266_vm3, %v264_v38, %v265_v39  ;;  %v268_v46 = vsel %vm266_vm3, %v265_v39, %v264_v38 }
  0x1e   : > { %722 = vmatpush3.bf16.msra.mxu0 %v789_v15  ;;  %754 = vmatprep.subr.bf16.mxu1 %v807_v1  ;;  %v705_v47 = vpack.c.bf16 %v277_v44, %v276_v43  ;;  %v701_v48 = vpack.c.bf16 %v267_v45, %v268_v46 }
  0x1f   : > { %723 = vmatprep.subr.bf16.mxu0 %v790_v16  ;;  %507 = vmatprep.mubr.bf16.mxu0 %v281_v42 }
  0x21   : > { %755 = vmatpush3.bf16.msra.mxu1 %v791_v18 }
  0x22   : > { %724 = vmatpush3.bf16.msra.mxu0 %v792_v19  ;;  %756 = vmatprep.subr.bf16.mxu1 %v807_v1 }
  0x23   : > { %725 = vmatprep.subr.bf16.mxu0 %v793_v20 }
  0x25   : > { %757 = vmatpush3.bf16.msra.mxu1 %v794_v22 }
  0x26   : > { %726 = vmatpush3.bf16.msra.mxu0 %v795_v23  ;;  %758 = vmatprep.subr.bf16.mxu1 %v807_v1 }
  0x27   : > { %727 = vmatprep.subr.bf16.mxu0 %v796_v27 }
  0x29   : > { %759 = vmatpush3.bf16.msra.mxu1 %v797_v32 }
  0x2a   : > { %728 = vmatpush3.bf16.msra.mxu0 %v798_v35 }
  0x2c   : > { %761 = vmatmul.mubr.msk.bf16.vlgmr.msra.gmra.mxu1 %vm704_vm6, %v705_v47 }
  0x2d   : > { %702 = vmatmul.mubr.msk.bf16.vlgmr.msra.gmra.mxu0 %vm700_vm7, %v701_v48 }
  0xec   : > { %v550_v49 = vpop.f32.mrf.mxu1 }
  0xed   : > { %v729_v50 = vpop.f32.mrf.mxu0 }
  0xee   : > { %v762_v51 = vpop.f32.mrf.mxu1 }
  0xef   : > { %v730_v52 = vpop.f32.mrf.mxu0 }
  0xf0   : > { %v731_v53 = vadd.f32 %v730_v52, %v729_v50  ;;  %v553_v54 = vpop.f32.mrf.mxu1 }
  0xf1   : > { %v732_v55 = vpop.f32.mrf.mxu0 }
  0xf2   : > { %v551_v56 = vadd.f32 %v731_v53, %v550_v49  ;;  %v763_v57 = vpop.f32.mrf.mxu1 }
  0xf3   : > { %v733_v58 = vpop.f32.mrf.mxu0 }
  0xf4   : > { %557 = vst [vmem:[%s231_s8] sm:$0xff] %v551_v56  ;;  %v734_v59 = vadd.f32 %v733_v58, %v732_v55  ;;  %v567_v61 = vmul.f32 %v551_v56, %v551_v56 }
  0xf6   : > { %v554_v60 = vadd.f32 %v734_v59, %v553_v54 }
  0xf8   : > { %558 = vst [vmem:[%s231_s8 + $0x8] sm:$0xff] %v554_v60  ;;  %v559_v62 = vadd.f32 %v554_v60, %v551_v56  ;;  %v568_v63 = vmul.f32 %v554_v60, %v554_v60 }
  0xfa   : > { %v560_v0 = vrot.slane %v559_v62, 4  ;;  %v569_v1 = vadd.f32 %v568_v63, %v567_v61 }
  0xfc   : > { %v561_v2 = vadd.f32 %v560_v0, %v559_v62  ;;  %v570_v3 = vrot.slane %v569_v1, 4 }
  0xfe   : > { %v562_v4 = vrot.slane %v561_v2, 2  ;;  %v571_v5 = vadd.f32 %v570_v3, %v569_v1 }
 0x100   : > { %v563_v6 = vadd.f32 %v562_v4, %v561_v2  ;;  %v572_v7 = vrot.slane %v571_v5, 2 }
 0x102   : > { %v564_v8 = vrot.slane %v563_v6, 1  ;;  %v573_v9 = vadd.f32 %v572_v7, %v571_v5 }
 0x104   : > { %v565_v10 = vadd.f32 %v564_v8, %v563_v6  ;;  %v574_v11 = vrot.slane %v573_v9, 1 }
 0x106   : > { %566 = vst [vmem:[%s235_s11] sm:$0x1] %v565_v10  ;;  %v575_v12 = vadd.f32 %v574_v11, %v573_v9 }
 0x108   : > { %576 = vst [vmem:[%s235_s11 + $0x1] sm:$0x1] %v575_v12 }
 0x109 PF: > { %s16_s18 = sadd.s32 1, %s805_s18  }
 0x10a   : > { %p13_p4 = scmp.ge.s32.totalorder %s16_s18, 4  }
 0x10c   :  { %15 = sbr.rel (!%p13_p4) target bundleno = 1 (0x1), region = 78 }

</bundles_post_ra>
